<compile_context>
chip_gen: v7x
topology: tpu7x:2x2x1
jax: 0.10.0
libtpu: 0.0.40
codegen_flags: <defaults>
</compile_context>

<pallas_src>
import jax
import jax.numpy as jnp
from jax import lax
from jax.experimental import pallas as pl
from jax.experimental.pallas import tpu as pltpu


def _bf16_epilogue_default():
    try:
        kind = jax.devices()[0].device_kind.lower()
    except Exception:
        return True
    # v6e / v7x have bf16 VALUs; older generations keep the f32 epilogue.
    return not any(tag in kind for tag in ("v2", "v3", "v4", "v5"))


def _make_mlp_kernel(bf16_epilogue: bool):
    def mlp_kernel(x_ref, w1_ref, b1_ref, w2_ref, b2_ref, w3_ref, b3_ref, o_ref):
        # x : (tb, D_in) bf16    w1: (H, D_in) bf16   b1: (H, 1) f32
        # w2: (H, H)    bf16     b2: (H, 1)    f32
        # w3: (H, 1)    f32      b3: (1, 1)    f32    o: (1, tb) f32
        # Layer 1: h1 = w1 @ x^T, contracting the last axis of BOTH operands
        # (x stays in native (tb, D_in) layout; no wrapper transpose).
        h1 = lax.dot_general(
            w1_ref[...], x_ref[...],
            dimension_numbers=(((1,), (1,)), ((), ())),
            preferred_element_type=jnp.float32)                     # (H, tb) f32

        if bf16_epilogue:
            # bf16 VALU epilogue (v6e/v7x): one cast of the dot result, bf16
            # bias + ReLU; h1 is already the MXU input dtype for layer 2.
            h1 = h1.astype(jnp.bfloat16) + b1_ref[...].astype(jnp.bfloat16)
            h1 = jnp.maximum(h1, 0)                                 # (H, tb) bf16
        else:
            # f32 epilogue for chips without bf16 VALUs (v5e and older).
            h1 = jnp.maximum(h1 + b1_ref[...], 0.0).astype(jnp.bfloat16)

        h2 = jnp.dot(w2_ref[...], h1,
                     preferred_element_type=jnp.float32) + b2_ref[...]
        h2 = jnp.maximum(h2, 0.0)                                   # (H, tb) f32

        # Layer 3 (H -> 1): VPU multiply + sublane (XLU) reduce; lane-dense out.
        z = jnp.sum(h2 * w3_ref[...], axis=0, keepdims=True) + b3_ref[...]
        o_ref[...] = jax.nn.sigmoid(z).astype(o_ref.dtype)

    return mlp_kernel


def neural_network_forward(x, params, *, tile_b=1024, bf16_epilogue=None):
    """x: (B, 10) (or anything nn.Flatten maps to (B, 10)).  Returns (B, 1) f32."""
    if bf16_epilogue is None:
        bf16_epilogue = _bf16_epilogue_default()

    x = x.reshape(x.shape[0], -1)                        # nn.Flatten
    B, D_in = x.shape
    H = params["w1"].shape[0]
    assert D_in == params["w1"].shape[1]

    # Lane-aligned batch tile.  Cap it so that whenever the 128-padded batch is
    # >= 256 the grid has >= 2 steps -> both v7x TensorCores get work.
    B_pad128 = pl.cdiv(B, 128) * 128
    tb = max(128, (min(tile_b, 2048) // 128) * 128)
    if B_pad128 >= 256:
        tb = min(tb, max(128, (B_pad128 // 2 // 128) * 128))
    else:
        tb = min(tb, B_pad128)
    B_pad = pl.cdiv(B, tb) * tb
    grid = (B_pad // tb,)

    # x stays in native (B, D_in) layout; only a fused bf16 cast (+ zero pad of
    # the ragged tail) happens wrapper-side -- no transpose pass over HBM.
    x_bf16 = x.astype(jnp.bfloat16)
    if B_pad != B:
        x_bf16 = jnp.pad(x_bf16, ((0, B_pad - B), (0, 0)))

    out = pl.pallas_call(
        _make_mlp_kernel(bf16_epilogue),
        out_shape=jax.ShapeDtypeStruct((1, B_pad), jnp.float32),
        grid_spec=pltpu.PrefetchScalarGridSpec(
            num_scalar_prefetch=0,
            grid=grid,
            in_specs=[
                pl.BlockSpec((tb, D_in), lambda i: (i, 0)),   # x tile, native layout
                pl.BlockSpec((H, D_in), lambda i: (0, 0)),    # w1 (resident)
                pl.BlockSpec((H, 1), lambda i: (0, 0)),       # b1
                pl.BlockSpec((H, H), lambda i: (0, 0)),       # w2 (resident)
                pl.BlockSpec((H, 1), lambda i: (0, 0)),       # b2
                pl.BlockSpec((H, 1), lambda i: (0, 0)),       # w3 column
                pl.BlockSpec((1, 1), lambda i: (0, 0)),       # b3
            ],
            out_specs=pl.BlockSpec((1, tb), lambda i: (0, i)),  # lane-dense output
        ),
        compiler_params=pltpu.CompilerParams(
            dimension_semantics=("parallel",),
        ),
    )(x_bf16, params["w1"], params["b1"], params["w2"], params["b2"],
      params["w3"], params["b3"])

    return out[0, :B].reshape(B, 1)


def init_params(key):
    """Deterministic init mimicking nn.Linear's U(-1/sqrt(fan_in), 1/sqrt(fan_in)).
    w1/w2 are kept in PyTorch (out, in) layout as bf16 (MXU inputs); biases f32
    as (out, 1) columns; w3 is stored as an (in, 1) f32 column for the reduce."""
    def linear(key, fan_in, fan_out, w_dtype=jnp.bfloat16):
        kw, kb = jax.random.split(key)
        bound = 1.0 / jnp.sqrt(fan_in)
        w = jax.random.uniform(kw, (fan_out, fan_in), jnp.float32, -bound, bound)
        b = jax.random.uniform(kb, (fan_out, 1), jnp.float32, -bound, bound)
        return w.astype(w_dtype), b

    k1, k2, k3 = jax.random.split(key, 3)
    w1, b1 = linear(k1, 10, 256)
    w2, b2 = linear(k2, 256, 256)
    w3, b3 = linear(k3, 256, 1, w_dtype=jnp.float32)   # used on VPU, keep f32
    return {"w1": w1, "b1": b1, "w2": w2, "b2": b2, "w3": w3.T, "b3": b3}


def reference_forward(x, p):
    """Pure-JAX f32 reference with PyTorch semantics: y = x @ W.T + b."""
    x = x.reshape(x.shape[0], -1).astype(jnp.float32)
    w1 = p["w1"].astype(jnp.float32)
    w2 = p["w2"].astype(jnp.float32)
    h1 = jnp.maximum(x @ w1.T + p["b1"].T, 0.0)
    h2 = jnp.maximum(h1 @ w2.T + p["b2"].T, 0.0)
    z = h2 @ p["w3"] + p["b3"].T
    return jax.nn.sigmoid(z)


if __name__ == "__main__":
    key = jax.random.PRNGKey(0)
    kx, kp = jax.random.split(key)
    params = init_params(kp)

    # Ragged small batch: 300 -> tb=128, grid=(3,) (>=2 steps, exercises padding).
    B_small = 300
    x_small = jax.random.normal(kx, (B_small, 10), jnp.float32)
    out_small = jax.block_until_ready(neural_network_forward(x_small, params))
    ref_small = reference_forward(x_small, params)
    assert out_small.shape == (B_small, 1)
    assert jnp.allclose(out_small, ref_small, atol=2e-2), float(
        jnp.max(jnp.abs(out_small - ref_small)))

    # Larger ragged batch: 2500 -> tb=1024, grid=(3,) (exercises the big-tile path).
    B_large = 2500
    x_large = jax.random.normal(jax.random.fold_in(kx, 1), (B_large, 10), jnp.float32)
    out_large = jax.block_until_ready(neural_network_forward(x_large, params))
    ref_large = reference_forward(x_large, params)
    assert out_large.shape == (B_large, 1)
    assert jnp.allclose(out_large, ref_large, atol=2e-2), float(
        jnp.max(jnp.abs(out_large - ref_large)))

    print("KERNEL_OK")
</pallas_src>

<mosaic_0001>
module attributes {stable_mosaic.version = 11 : i64} {
  func.func @mlp_kernel(%arg0: i32, %arg1: memref<128x10xbf16, #tpu.memory_space<vmem>>, %arg2: memref<256x10xbf16, #tpu.memory_space<vmem>>, %arg3: memref<256x1xf32, #tpu.memory_space<vmem>>, %arg4: memref<256x256xbf16, #tpu.memory_space<vmem>>, %arg5: memref<256x1xf32, #tpu.memory_space<vmem>>, %arg6: memref<256x1xf32, #tpu.memory_space<vmem>>, %arg7: memref<1x1xf32, #tpu.memory_space<vmem>>, %arg8: memref<1x128xf32, #tpu.memory_space<vmem>>) attributes {dimension_semantics = [#tpu.dimension_semantics<parallel>], iteration_bounds = array<i64: 3>, scalar_prefetch = 0 : i64, scratch_operands = 0 : i64, tpu.core_type = #tpu.core_type<tc>, window_params = [{transform_indices = @transform_0, window_bounds = array<i64: 128, 10>}, {pipeline_mode = #tpu.pipeline_mode<synchronous>, transform_indices = @transform_1, window_bounds = array<i64: 256, 10>}, {pipeline_mode = #tpu.pipeline_mode<synchronous>, transform_indices = @transform_2, window_bounds = array<i64: 256, 1>}, {pipeline_mode = #tpu.pipeline_mode<synchronous>, transform_indices = @transform_3, window_bounds = array<i64: 256, 256>}, {pipeline_mode = #tpu.pipeline_mode<synchronous>, transform_indices = @transform_4, window_bounds = array<i64: 256, 1>}, {pipeline_mode = #tpu.pipeline_mode<synchronous>, transform_indices = @transform_5, window_bounds = array<i64: 256, 1>}, {pipeline_mode = #tpu.pipeline_mode<synchronous>, transform_indices = @transform_6, window_bounds = array<i64: 1, 1>}, {transform_indices = @transform_7, window_bounds = array<i64: 1, 128>}]} {
    %c0 = arith.constant 0 : index
    %c0_0 = arith.constant 0 : index
    %0 = vector.load %arg2[%c0, %c0_0] : memref<256x10xbf16, #tpu.memory_space<vmem>>, vector<256x10xbf16>
    %c0_1 = arith.constant 0 : index
    %c0_2 = arith.constant 0 : index
    %1 = vector.load %arg1[%c0_1, %c0_2] : memref<128x10xbf16, #tpu.memory_space<vmem>>, vector<128x10xbf16>
    %cst = arith.constant dense<0.000000e+00> : vector<256x128xf32>
    %2 = tpu.matmul %0, %1, %cst {dimension_numbers = #tpu.dot_dimension_numbers<[1], [1], [0], [0], [0, 0, 1, 0], [], []>} : vector<256x10xbf16>, vector<128x10xbf16>, vector<256x128xf32> -> vector<256x128xf32>
    %3 = arith.truncf %2 : vector<256x128xf32> to vector<256x128xbf16>
    %c0_3 = arith.constant 0 : index
    %c0_4 = arith.constant 0 : index
    %4 = vector.load %arg3[%c0_3, %c0_4] : memref<256x1xf32, #tpu.memory_space<vmem>>, vector<256x1xf32>
    %5 = arith.truncf %4 : vector<256x1xf32> to vector<256x1xbf16>
    %6 = vector.broadcast %5 : vector<256x1xbf16> to vector<256x128xbf16>
    %7 = arith.addf %3, %6 : vector<256x128xbf16>
    %cst_5 = arith.constant 0.000000e+00 : bf16
    %8 = vector.broadcast %cst_5 : bf16 to vector<256x128xbf16>
    %9 = arith.maximumf %7, %8 : vector<256x128xbf16>
    %c0_6 = arith.constant 0 : index
    %c0_7 = arith.constant 0 : index
    %10 = vector.load %arg4[%c0_6, %c0_7] : memref<256x256xbf16, #tpu.memory_space<vmem>>, vector<256x256xbf16>
    %cst_8 = arith.constant dense<0.000000e+00> : vector<256x128xf32>
    %11 = tpu.matmul %10, %9, %cst_8 {dimension_numbers = #tpu.dot_dimension_numbers<[1], [0], [0], [1], [0, 0, 1, 1], [], []>} : vector<256x256xbf16>, vector<256x128xbf16>, vector<256x128xf32> -> vector<256x128xf32>
    %c0_9 = arith.constant 0 : index
    %c0_10 = arith.constant 0 : index
    %12 = vector.load %arg5[%c0_9, %c0_10] : memref<256x1xf32, #tpu.memory_space<vmem>>, vector<256x1xf32>
    %13 = vector.broadcast %12 : vector<256x1xf32> to vector<256x128xf32>
    %14 = arith.addf %11, %13 : vector<256x128xf32>
    %cst_11 = arith.constant 0.000000e+00 : f32
    %15 = vector.broadcast %cst_11 : f32 to vector<256x128xf32>
    %16 = arith.maximumf %14, %15 : vector<256x128xf32>
    %c0_12 = arith.constant 0 : index
    %c0_13 = arith.constant 0 : index
    %17 = vector.load %arg6[%c0_12, %c0_13] : memref<256x1xf32, #tpu.memory_space<vmem>>, vector<256x1xf32>
    %18 = vector.broadcast %17 : vector<256x1xf32> to vector<256x128xf32>
    %19 = arith.mulf %16, %18 : vector<256x128xf32>
    %cst_14 = arith.constant dense<0.000000e+00> : vector<128xf32>
    %20 = vector.multi_reduction <add>, %19, %cst_14 [0] : vector<256x128xf32> to vector<128xf32>
    %21 = vector.shape_cast %20 : vector<128xf32> to vector<1x128xf32>
    %c0_15 = arith.constant 0 : index
    %c0_16 = arith.constant 0 : index
    %22 = vector.load %arg7[%c0_15, %c0_16] : memref<1x1xf32, #tpu.memory_space<vmem>>, vector<1x1xf32>
    %23 = vector.broadcast %22 : vector<1x1xf32> to vector<1x128xf32>
    %24 = arith.addf %21, %23 : vector<1x128xf32>
    %25 = arith.negf %24 : vector<1x128xf32>
    %26 = math.exp %25 : vector<1x128xf32>
    %cst_17 = arith.constant 1.000000e+00 : f32
    %27 = vector.broadcast %cst_17 : f32 to vector<1x128xf32>
    %28 = arith.addf %27, %26 : vector<1x128xf32>
    %29 = arith.divf %27, %28 : vector<1x128xf32>
    %c0_18 = arith.constant 0 : index
    %c0_19 = arith.constant 0 : index
    %30 = vector.load %arg8[%c0_18, %c0_19] : memref<1x128xf32, #tpu.memory_space<vmem>>, vector<1x128xf32>
    tpu.vector_store %arg8[%c0_18, %c0_19], %29 {strides = array<i32>} : memref<1x128xf32, #tpu.memory_space<vmem>>, vector<1x128xf32>,
    return
  }
  func.func @transform_0(%arg0: i32) -> (i32, i32) {
    %c0_i32 = arith.constant 0 : i32
    %c0_i32_0 = arith.constant 0 : i32
    return %arg0, %c0_i32 : i32, i32
  }
  func.func @transform_1(%arg0: i32) -> (i32, i32) {
    %c0_i32 = arith.constant 0 : i32
    %c0_i32_0 = arith.constant 0 : i32
    %c0_i32_1 = arith.constant 0 : i32
    return %c0_i32, %c0_i32_0 : i32, i32
  }
  func.func @transform_2(%arg0: i32) -> (i32, i32) {
    %c0_i32 = arith.constant 0 : i32
    %c0_i32_0 = arith.constant 0 : i32
    %c0_i32_1 = arith.constant 0 : i32
    return %c0_i32, %c0_i32_0 : i32, i32
  }
  func.func @transform_3(%arg0: i32) -> (i32, i32) {
    %c0_i32 = arith.constant 0 : i32
    %c0_i32_0 = arith.constant 0 : i32
    %c0_i32_1 = arith.constant 0 : i32
    return %c0_i32, %c0_i32_0 : i32, i32
  }
  func.func @transform_4(%arg0: i32) -> (i32, i32) {
    %c0_i32 = arith.constant 0 : i32
    %c0_i32_0 = arith.constant 0 : i32
    %c0_i32_1 = arith.constant 0 : i32
    return %c0_i32, %c0_i32_0 : i32, i32
  }
  func.func @transform_5(%arg0: i32) -> (i32, i32) {
    %c0_i32 = arith.constant 0 : i32
    %c0_i32_0 = arith.constant 0 : i32
    %c0_i32_1 = arith.constant 0 : i32
    return %c0_i32, %c0_i32_0 : i32, i32
  }
  func.func @transform_6(%arg0: i32) -> (i32, i32) {
    %c0_i32 = arith.constant 0 : i32
    %c0_i32_0 = arith.constant 0 : i32
    %c0_i32_1 = arith.constant 0 : i32
    return %c0_i32, %c0_i32_0 : i32, i32
  }
  func.func @transform_7(%arg0: i32) -> (i32, i32) {
    %c0_i32 = arith.constant 0 : i32
    %c0_i32_0 = arith.constant 0 : i32
    return %c0_i32, %arg0 : i32, i32
  }
}

</mosaic_0001>

<bundles_post_ra>
// kernel: tpu_custom_call.1
= control target key start
LH: loop header
LB: loop body
LE: loop exit
PB: predicated region body
PF: predicated region fallthrough
CT: control target
= control target key end

     0   :  { %s2984_s0 = inlined_call_operand.vmem [shape: bf16[384,10], index: 0, kind: input, shape index: {}]   ;;  %s2985_s1 = inlined_call_operand.vmem [shape: bf16[256,10], index: 1, kind: input, shape index: {}]   ;;  %s2986_s2 = inlined_call_operand.vmem [shape: f32[256,1], index: 2, kind: input, shape index: {}]   ;;  %s2987_s3 = inlined_call_operand.vmem [shape: bf16[256,256], index: 3, kind: input, shape index: {}]   ;;  %s2988_s4 = inlined_call_operand.vmem [shape: f32[256,1], index: 4, kind: input, shape index: {}]   ;;  %s2989_s5 = inlined_call_operand.vmem [shape: f32[256,1], index: 5, kind: input, shape index: {}]   ;;  %s2990_s6 = inlined_call_operand.<no memory space> [shape: f32[1,1], index: 6, kind: input, shape index: {}]   ;;  %s2991_s7 = inlined_call_operand.hbm [shape: f32[1,384], index: 7, kind: output, shape index: {}]  }
   0x1   :  { %v12_v0 = vstv %s2990_s6 }
   0x2   :  { %13 = vst [vmem:[#allocation2] sm:$0x1] %v12_v0 }
   0x3   :  { %14 = vsyncpa [#allocation4], 0 }
   0x4   :  { %16 = vsyncpa [#allocation4 + $0x1], 0  ;;  %s2300_s26 = smov 0   ;;  %s2302_s27 = smov 0  }
   0x5   :  { %s2304_s28 = smov 0   ;;  %s2306_s29 = smov 0  }
   0x6 LB: > { %s1782_s6 = sadd.s32 4294967295, %s2253_s29   ;;  %s1783_s30 = sadd.s32 4294967294, %s2253_s29   ;;  %s2253_s29 = sphi %s2306_s29, %s2997_s29   ;;  %s2249_s28 = sphi %s2304_s28, %s2996_s28   ;;  %s2245_s27 = sphi %s2302_s27, %s2995_s27   ;;  %s2241_s26 = sphi %s2300_s26, %s2994_s26  }
   0x7   : > { %s2323_s8 = sadd.s32 1, %s2253_s29   ;;  %s181_s9 = sadd.s32 1, %s2249_s28 }
   0x8   : > { %s178_s10 = ssub.s32 %s2253_s29, %s2323_s8  ;;  %p191_p0 = scmp.ne.s32.totalorder %s2249_s28, %s2245_s27 }
   0x9   : > { %p179_p1 = scmp.eq.s32.totalorder %s178_s10, 0  ;;  %p192_p2 = scmp.eq.s32.totalorder %s1782_s6, 2 }
   0xa   : > { %p197_p3 = scmp.ne.s32.totalorder %s2245_s27, %s2241_s26  ;;  %p198_p4 = scmp.eq.s32.totalorder %s1783_s30, 2 }
   0xb   : > { %s2333_s11 = scalar_select %p179_p1, %s2249_s28, %s181_s9  }
   0xc   : > { %p2335_p5 = por %p192_p2, %p191_p0  ;;  %p2339_p6 = por %p198_p4, %p197_p3 }
   0xd   : > { %p1786_p7 = scmp.ge.s32.totalorder %s2253_s29, 1  ;;  %p243_p8 = scmp.lt.s32.totalorder %s2253_s29, 4 }
   0xf   : > { %p244_p9 = pnand %p1786_p7, %p243_p8 }
  0x10   : > { %s2345_s14 = sshll.u32 (!%p244_p9), %s1782_s6, 4  ;;  %v715_v1 = vld [vmem:[%s2986_s2 + $0x80] sm:$0xff] (!%p244_p9)  ;;  %v716_v2 = vld [vmem:[%s2986_s2 + $0x88] sm:$0xff] (!%p244_p9)  ;;  %v2255_v4 = vmov (!%p244_p9), 0   ;;  %v717_v7 = vld [vmem:[%s2986_s2 + $0x90] sm:$0xff] (!%p244_p9)  ;;  %vm449_vm0 = vcmask (!%p244_p9), 80896  }
  0x11   : > { %247 = sbr.rel (%p244_p9) target bundleno = 761 (0x2f9), region = 48  ;;  %v699_v3 = vld [vmem:[%s2986_s2] sm:$0xff] (!%p244_p9)  ;;  %p275_p10 = scmp.lt.s32.totalorder (!%p244_p9), %s2345_s14, 47  ;;  %2113 = vset.pattern.permute.xlu0 (!%p244_p9), %v2255_v4  ;;  %v739_v5 = vpack.c.bf16 (!%p244_p9), %v716_v2, %v715_v1  ;;  %v700_v6 = vld [vmem:[%s2986_s2 + $0x8] sm:$0xff] (!%p244_p9)  ;;  %2114 = vset.pattern.permute.xlu1 (!%p244_p9), %v2255_v4  ;;  %v718_v8 = vld [vmem:[%s2986_s2 + $0x98] sm:$0xff] (!%p244_p9) }
  0x12   : > { %v740_v9 = vpack.c.bf16 (!%p244_p9), %v718_v8, %v717_v7  ;;  %v701_v10 = vld [vmem:[%s2986_s2 + $0x10] sm:$0xff] (!%p244_p9)  ;;  %v731_v11 = vpack.c.bf16 (!%p244_p9), %v700_v6, %v699_v3  ;;  %v702_v12 = vld [vmem:[%s2986_s2 + $0x18] sm:$0xff] (!%p244_p9)  ;;  %v719_v13 = vld [vmem:[%s2986_s2 + $0xa0] sm:$0xff] (!%p244_p9)  ;;  %s272_s30 = sand.u32 (!%p244_p9), 1, %s2245_s27   ;;  %s2942_s17 = scalar_lea.hbm (!%p244_p9), %s2991_s7, %s2345_s14 }
  0x13   : > { %789 = vperm.xlu0 (!%p244_p9), %2113, %v739_v5   ;;  %v720_v14 = vld [vmem:[%s2986_s2 + $0xa8] sm:$0xff] (!%p244_p9)  ;;  %v732_v15 = vpack.c.bf16 (!%p244_p9), %v702_v12, %v701_v10  ;;  %v703_v16 = vld [vmem:[%s2986_s2 + $0x20] sm:$0xff] (!%p244_p9)  ;;  %v721_v18 = vld [vmem:[%s2986_s2 + $0xb0] sm:$0xff] (!%p244_p9)  ;;  %s273_s15 = scalar_lea.vmem (!%p244_p9), [#allocation3], %s272_s30  ;;  %s1716_s18 = scalar_lea.sflag (!%p244_p9), [#allocation4], %s272_s30 }
  0x14   : > { %794 = vperm.xlu1 (!%p244_p9), %2114, %v740_v9   ;;  %v704_v17 = vld [vmem:[%s2986_s2 + $0x28] sm:$0xff] (!%p244_p9)  ;;  %v722_v19 = vld [vmem:[%s2986_s2 + $0xb8] sm:$0xff] (!%p244_p9)  ;;  %v741_v21 = vpack.c.bf16 (!%p244_p9), %v720_v14, %v719_v13  ;;  %v705_v22 = vld [vmem:[%s2986_s2 + $0x30] sm:$0xff] (!%p244_p9)  ;;  %s1728_s16 = sshll.u32 (!%p244_p9), %s273_s15, 4  ;;  %s2256_s20 = smov (!%p244_p9), [#allocation3]   ;;  %s2944_s16 = int_to_ptr.vmem [resolvable:$true] %s1728_s16 }
  0x15   : > { %v733_v24 = vpack.c.bf16 (!%p244_p9), %v704_v17, %v703_v16  ;;  %v706_v26 = vld [vmem:[%s2986_s2 + $0x38] sm:$0xff] (!%p244_p9)  ;;  %v742_v27 = vpack.c.bf16 (!%p244_p9), %v722_v19, %v721_v18  ;;  %v723_v28 = vld [vmem:[%s2986_s2 + $0xc0] sm:$0xff] (!%p244_p9)  ;;  %v724_v29 = vld [vmem:[%s2986_s2 + $0xc8] sm:$0xff] (!%p244_p9)  ;;  %s2191_s19 = scalar_lea.vmem (!%p244_p9), %s2944_s16, 16 }
  0x16   : > { %v734_v30 = vpack.c.bf16 (!%p244_p9), %v706_v26, %v705_v22  ;;  %v707_v31 = vld [vmem:[%s2986_s2 + $0x40] sm:$0xff] (!%p244_p9)  ;;  %v708_v32 = vld [vmem:[%s2986_s2 + $0x48] sm:$0xff] (!%p244_p9)  ;;  %v743_v35 = vpack.c.bf16 (!%p244_p9), %v724_v29, %v723_v28  ;;  %v725_v36 = vld [vmem:[%s2986_s2 + $0xd0] sm:$0xff] (!%p244_p9)  ;;  %p2192_p11 = scmp.ne.s32.totalorder (!%p244_p9), %s2944_s16, %s2191_s19 }
  0x17   : > { %749 = vperm.xlu0 (!%p244_p9), %2113, %v731_v11   ;;  %v726_v37 = vld [vmem:[%s2986_s2 + $0xd8] sm:$0xff] (!%p244_p9)  ;;  %v735_v38 = vpack.c.bf16 (!%p244_p9), %v708_v32, %v707_v31  ;;  %v709_v39 = vld [vmem:[%s2986_s2 + $0x50] sm:$0xff] (!%p244_p9)  ;;  %v727_v42 = vld [vmem:[%s2986_s2 + $0xe0] sm:$0xff] (!%p244_p9) }
  0x18   : > { %s276_s10 = scalar_select %p275_p10, %s2345_s14, 47  ;;  %754 = vperm.xlu1 %2114, %v732_v15   ;;  %v710_v40 = vld [vmem:[%s2986_s2 + $0x58] sm:$0xff]  ;;  %v744_v41 = vpack.c.bf16 %v726_v37, %v725_v36  ;;  %v728_v43 = vld [vmem:[%s2986_s2 + $0xe8] sm:$0xff]  ;;  %v711_v44 = vld [vmem:[%s2986_s2 + $0x60] sm:$0xff] }
  0x19   : > { %v736_v45 = vpack.c.bf16 %v710_v40, %v709_v39  ;;  %v2123_v46 = vld [vmem:[%s2985_s1] sm:$0xff]   ;;  %v712_v47 = vld [vmem:[%s2986_s2 + $0x68] sm:$0xff]  ;;  %v745_v50 = vpack.c.bf16 %v728_v43, %v727_v42  ;;  %v729_v51 = vld [vmem:[%s2986_s2 + $0xf0] sm:$0xff]  ;;  %p2193_p12 = pnand %p2192_p11, %p2335_p5 }
  0x1a   : > { %s1788_s21 = sshll.u32 %s276_s10, 2  ;;  %2017 = vmatprep.mubr.msk.bf16.mxu0 %vm449_vm0, %v2123_v46  ;;  %v730_v52 = vld [vmem:[%s2986_s2 + $0xf8] sm:$0xff]  ;;  %v737_v53 = vpack.c.bf16 %v712_v47, %v711_v44  ;;  %v713_v54 = vld [vmem:[%s2986_s2 + $0x70] sm:$0xff]  ;;  %v891_v60 = vld [vmem:[%s2988_s4] sm:$0xff] }
  0x1b   : > { %s2390_s9 = scalar_lea.vmem %s2984_s0, %s1788_s21  ;;  %799 = vperm.xlu0 %2113, %v741_v21   ;;  %v714_v55 = vld [vmem:[%s2986_s2 + $0x78] sm:$0xff]  ;;  %v746_v56 = vpack.c.bf16 %v730_v52, %v729_v51  ;;  %v892_v61 = vld [vmem:[%s2988_s4 + $0x8] sm:$0xff]  ;;  %v893_v62 = vld [vmem:[%s2988_s4 + $0x10] sm:$0xff]  ;;  %p2194_p13 = pneg %p2193_p12 }
  0x1c   : > { %v2115_v20 = vld [vmem:[%s2390_s9] sm:$0xff]   ;;  %v2116_v23 = vld [vmem:[%s2390_s9 + $0x8] sm:$0xff]   ;;  %759 = vperm.xlu1 %2114, %v733_v24   ;;  %v2117_v34 = vld [vmem:[%s2390_s9 + $0x10] sm:$0xff]   ;;  %v738_v57 = vpack.c.bf16 %v714_v55, %v713_v54  ;;  %s2195_s21 = sshll.u32 %s2256_s20, 4  ;;  %s2196_s21 = int_to_ptr.vmem [resolvable:$false] %s2195_s21 }
  0x1d   : > { %2065 = vmatprep.subr.msk.bf16.mxu0 %vm449_vm0, %v2115_v20  ;;  %v499_v25 = vsel %vm449_vm0, %v2115_v20, 0  ;;  %v502_v33 = vsel %vm449_vm0, %v2116_v23, 0  ;;  %v2118_v48 = vld [vmem:[%s2390_s9 + $0x18] sm:$0xff]   ;;  %v505_v49 = vsel %vm449_vm0, %v2117_v34, 0  ;;  %v2119_v59 = vld [vmem:[%s2390_s9 + $0x20] sm:$0xff]   ;;  %v2120_v1 = vld [vmem:[%s2390_s9 + $0x28] sm:$0xff]   ;;  %p2198_p0 = scmp.lt.s32.totalorder %s2944_s16, %s2196_s21 }
  0x1e   : > { %2002 = vmatpush3.bf16.xpose.msra.mxu0 %v499_v25  ;;  %v508_v58 = vsel %vm449_vm0, %v2118_v48, 0  ;;  %v894_v63 = vld [vmem:[%s2988_s4 + $0x18] sm:$0xff]  ;;  %v511_v0 = vsel %vm449_vm0, %v2119_v59, 0  ;;  %v895_v2 = vld [vmem:[%s2988_s4 + $0x20] sm:$0xff]  ;;  %v896_v3 = vld [vmem:[%s2988_s4 + $0x28] sm:$0xff]  ;;  %v514_v7 = vsel %vm449_vm0, %v2120_v1, 0 }
  0x1f   : > { %2066 = vmatprep.subr.msk.bf16.mxu0 %vm449_vm0, %v2116_v23  ;;  %804 = vperm.xlu0 %2113, %v742_v27   ;;  %v897_v5 = vld [vmem:[%s2988_s4 + $0x30] sm:$0xff]  ;;  %v898_v6 = vld [vmem:[%s2988_s4 + $0x38] sm:$0xff]  ;;  %v899_v9 = vld [vmem:[%s2988_s4 + $0x40] sm:$0xff]  ;;  %s2197_s22 = scalar_lea.vmem %s2196_s21, 32 }
  0x20   : > { %764 = vperm.xlu1 %2114, %v734_v30   ;;  %v2121_v8 = vld [vmem:[%s2390_s9 + $0x30] sm:$0xff]   ;;  %v900_v10 = vld [vmem:[%s2988_s4 + $0x48] sm:$0xff]  ;;  %v902_v12 = vld [vmem:[%s2988_s4 + $0x58] sm:$0xff]  ;;  %p2199_p1 = scmp.lt.s32.totalorder %s2197_s22, %s2191_s19 }
  0x21   : > { %v901_v11 = vld [vmem:[%s2988_s4 + $0x50] sm:$0xff]  ;;  %v517_v13 = vsel %vm449_vm0, %v2121_v8, 0  ;;  %v2122_v14 = vld [vmem:[%s2390_s9 + $0x38] sm:$0xff]   ;;  %v903_v15 = vld [vmem:[%s2988_s4 + $0x60] sm:$0xff] }
  0x22   : > { %v904_v16 = vld [vmem:[%s2988_s4 + $0x68] sm:$0xff]  ;;  %v905_v17 = vld [vmem:[%s2988_s4 + $0x70] sm:$0xff]  ;;  %v906_v18 = vld [vmem:[%s2988_s4 + $0x78] sm:$0xff]  ;;  %v520_v20 = vsel %vm449_vm0, %v2122_v14, 0  ;;  %p2200_p2 = por %p2199_p1, %p2198_p0 }
  0x23   : > { %809 = vperm.xlu0 %2113, %v743_v35   ;;  %v907_v19 = vld [vmem:[%s2988_s4 + $0x80] sm:$0xff]  ;;  %v908_v21 = vld [vmem:[%s2988_s4 + $0x88] sm:$0xff]  ;;  %v909_v22 = vld [vmem:[%s2988_s4 + $0x90] sm:$0xff] }
  0x24   : > { %769 = vperm.xlu1 %2114, %v735_v38   ;;  %v2124_v23 = vld [vmem:[%s2985_s1 + $0x8] sm:$0xff]   ;;  %v910_v24 = vld [vmem:[%s2988_s4 + $0x98] sm:$0xff]  ;;  %v2125_v25 = vld [vmem:[%s2985_s1 + $0x10] sm:$0xff]   ;;  %p2201_p3 = pnand %p2200_p2, %p2194_p13 }
  0x25   : > { %v911_v26 = vld [vmem:[%s2988_s4 + $0xa0] sm:$0xff]  ;;  %v912_v27 = vld [vmem:[%s2988_s4 + $0xa8] sm:$0xff]  ;;  %v913_v28 = vld [vmem:[%s2988_s4 + $0xb0] sm:$0xff] }
  0x26   : > { %2004 = vmatpush3.bf16.xpose.msra.mxu0 %v502_v33  ;;  %v2126_v29 = vld [vmem:[%s2985_s1 + $0x18] sm:$0xff]   ;;  %v1436_v30 = vld [vmem:[%s2989_s5] sm:$0xff]  ;;  %v1437_v32 = vld [vmem:[%s2989_s5 + $0x8] sm:$0xff] }
  0x27   : > { %2067 = vmatprep.subr.msk.bf16.mxu0 %vm449_vm0, %v2117_v34  ;;  %814 = vperm.xlu0 %2113, %v744_v41   ;;  %v2127_v31 = vld [vmem:[%s2985_s1 + $0x20] sm:$0xff]   ;;  %v1438_v33 = vld [vmem:[%s2989_s5 + $0x10] sm:$0xff]  ;;  %v1439_v34 = vld [vmem:[%s2989_s5 + $0x18] sm:$0xff] }
  0x28   : > { %774 = vperm.xlu1 %2114, %v736_v45   ;;  %v2128_v35 = vld [vmem:[%s2985_s1 + $0x28] sm:$0xff]   ;;  %v1440_v36 = vld [vmem:[%s2989_s5 + $0x20] sm:$0xff]  ;;  %v2129_v37 = vld [vmem:[%s2985_s1 + $0x30] sm:$0xff]  }
  0x29   : > { %v1441_v38 = vld [vmem:[%s2989_s5 + $0x28] sm:$0xff]  ;;  %v1442_v39 = vld [vmem:[%s2989_s5 + $0x30] sm:$0xff]  ;;  %v1443_v40 = vld [vmem:[%s2989_s5 + $0x38] sm:$0xff] }
  0x2a   : > { %v2130_v41 = vld [vmem:[%s2985_s1 + $0x38] sm:$0xff]   ;;  %v1444_v42 = vld [vmem:[%s2989_s5 + $0x40] sm:$0xff]  ;;  %v1445_v44 = vld [vmem:[%s2989_s5 + $0x48] sm:$0xff] }
  0x2b   : > { %819 = vperm.xlu0 %2113, %v745_v50   ;;  %v2131_v43 = vld [vmem:[%s2985_s1 + $0x40] sm:$0xff]   ;;  %v1446_v45 = vld [vmem:[%s2989_s5 + $0x50] sm:$0xff]  ;;  %v1447_v46 = vld [vmem:[%s2989_s5 + $0x58] sm:$0xff] }
  0x2c   : > { %779 = vperm.xlu1 %2114, %v737_v53   ;;  %v2132_v47 = vld [vmem:[%s2985_s1 + $0x48] sm:$0xff]   ;;  %v1450_v51 = vld [vmem:[%s2989_s5 + $0x70] sm:$0xff]  ;;  %v1451_v52 = vld [vmem:[%s2989_s5 + $0x78] sm:$0xff] }
  0x2d   : > { %v1449_v50 = vld [vmem:[%s2989_s5 + $0x68] sm:$0xff]  ;;  %v2134_v53 = vld [vmem:[%s2985_s1 + $0x58] sm:$0xff]   ;;  %v1452_v54 = vld [vmem:[%s2989_s5 + $0x80] sm:$0xff] }
  0x2e   : > { %2006 = vmatpush3.bf16.xpose.msra.mxu0 %v505_v49  ;;  %v2133_v49 = vld [vmem:[%s2985_s1 + $0x50] sm:$0xff]   ;;  %v2135_v55 = vld [vmem:[%s2985_s1 + $0x60] sm:$0xff]  }
  0x2f   : > { %2068 = vmatprep.subr.msk.bf16.mxu0 %vm449_vm0, %v2118_v48  ;;  %824 = vperm.xlu0 %2113, %v746_v56   ;;  %v1448_v48 = vld [vmem:[%s2989_s5 + $0x60] sm:$0xff]  ;;  %v1453_v56 = vld [vmem:[%s2989_s5 + $0x88] sm:$0xff] }
  0x30   : > { %784 = vperm.xlu1 %2114, %v738_v57   ;;  %v1454_v57 = vld [vmem:[%s2989_s5 + $0x90] sm:$0xff] }
  0x33   : > { %925 = vperm.xlu0 %2113, %v891_v60   ;;  %v1456_v60 = vld [vmem:[%s2989_s5 + $0xa0] sm:$0xff] }
  0x34   : > { %930 = vperm.xlu1 %2114, %v892_v61   ;;  %v2137_v61 = vld [vmem:[%s2985_s1 + $0x70] sm:$0xff]  }
  0x36   : > { %2008 = vmatpush3.bf16.xpose.msra.mxu0 %v508_v58  ;;  %v1455_v58 = vld [vmem:[%s2989_s5 + $0x98] sm:$0xff] }
  0x37   : > { %2069 = vmatprep.subr.msk.bf16.mxu0 %vm449_vm0, %v2119_v59  ;;  %935 = vperm.xlu0 %2113, %v893_v62   ;;  %v2136_v59 = vld [vmem:[%s2985_s1 + $0x68] sm:$0xff]   ;;  %v914_v62 = vld [vmem:[%s2988_s4 + $0xb8] sm:$0xff] }
  0x38   : > { %940 = vperm.xlu1 %2114, %v894_v63   ;;  %v1457_v63 = vld [vmem:[%s2989_s5 + $0xa8] sm:$0xff] }
  0x3b   : > { %945 = vperm.xlu0 %2113, %v895_v2   ;;  %v1458_v2 = vld [vmem:[%s2989_s5 + $0xb0] sm:$0xff] }
  0x3c   : > { %950 = vperm.xlu1 %2114, %v896_v3   ;;  %v916_v3 = vld [vmem:[%s2988_s4 + $0xc8] sm:$0xff] }
  0x3e   : > { %2010 = vmatpush3.bf16.xpose.msra.mxu0 %v511_v0  ;;  %v915_v0 = vld [vmem:[%s2988_s4 + $0xc0] sm:$0xff] }
  0x3f   : > { %2070 = vmatprep.subr.msk.bf16.mxu0 %vm449_vm0, %v2120_v1  ;;  %955 = vperm.xlu0 %2113, %v897_v5   ;;  %v2138_v1 = vld [vmem:[%s2985_s1 + $0x78] sm:$0xff]  }
  0x40   : > { %960 = vperm.xlu1 %2114, %v898_v6   ;;  %v1459_v5 = vld [vmem:[%s2989_s5 + $0xb8] sm:$0xff]  ;;  %v917_v6 = vld [vmem:[%s2988_s4 + $0xd0] sm:$0xff] }
  0x43   : > { %965 = vperm.xlu0 %2113, %v899_v9   ;;  %v1461_v9 = vld [vmem:[%s2989_s5 + $0xc8] sm:$0xff] }
  0x44   : > { %970 = vperm.xlu1 %2114, %v900_v10   ;;  %v919_v10 = vld [vmem:[%s2988_s4 + $0xe0] sm:$0xff] }
  0x46   : > { %2012 = vmatpush3.bf16.xpose.msra.mxu0 %v514_v7  ;;  %v1460_v7 = vld [vmem:[%s2989_s5 + $0xc0] sm:$0xff] }
  0x47   : > { %2071 = vmatprep.subr.msk.bf16.mxu0 %vm449_vm0, %v2121_v8  ;;  %975 = vperm.xlu0 %2113, %v901_v11   ;;  %v918_v8 = vld [vmem:[%s2988_s4 + $0xd8] sm:$0xff]  ;;  %v1462_v11 = vld [vmem:[%s2989_s5 + $0xd0] sm:$0xff] }
  0x48   : > { %980 = vperm.xlu1 %2114, %v902_v12   ;;  %v920_v12 = vld [vmem:[%s2988_s4 + $0xe8] sm:$0xff] }
  0x4b   : > { %985 = vperm.xlu0 %2113, %v903_v15   ;;  %v1464_v15 = vld [vmem:[%s2989_s5 + $0xe0] sm:$0xff] }
  0x4c   : > { %990 = vperm.xlu1 %2114, %v904_v16   ;;  %v922_v16 = vld [vmem:[%s2988_s4 + $0xf8] sm:$0xff] }
  0x4e   : > { %2014 = vmatpush3.bf16.xpose.msra.mxu0 %v517_v13  ;;  %v1463_v13 = vld [vmem:[%s2989_s5 + $0xd8] sm:$0xff] }
  0x4f   : > { %2072 = vmatprep.subr.msk.bf16.mxu0 %vm449_vm0, %v2122_v14  ;;  %995 = vperm.xlu0 %2113, %v905_v17   ;;  %v921_v14 = vld [vmem:[%s2988_s4 + $0xf0] sm:$0xff]  ;;  %v1465_v17 = vld [vmem:[%s2989_s5 + $0xe8] sm:$0xff] }
  0x50   : > { %1000 = vperm.xlu1 %2114, %v906_v18   ;;  %v1466_v18 = vld [vmem:[%s2989_s5 + $0xf0] sm:$0xff] }
  0x53   : > { %1005 = vperm.xlu0 %2113, %v907_v19   ;;  %v1467_v19 = vld [vmem:[%s2989_s5 + $0xf8] sm:$0xff] }
  0x54   : > { %1010 = vperm.xlu1 %2114, %v908_v21   ;;  %v2141_v21 = vld [vmem:[%s2987_s3 + $0x4] ss:$8 sps:$4 sm:$0xff]  }
  0x56   : > { %2016 = vmatpush3.bf16.xpose.msra.mxu0 %v520_v20  ;;  %v1697_v20 = vld [vmem:[#allocation2] sm:$0x1] }
  0x57   : > { %1015 = vperm.xlu0 %2113, %v909_v22   ;;  %v2144_v22 = vld [vmem:[%s2987_s3 + $0x24] ss:$8 sps:$4 sm:$0xff]  }
  0x58   : > { %1020 = vperm.xlu1 %2114, %v910_v24   ;;  %1291 = vmatprep.mubr.bf16.mxu1 %v2144_v22 }
  0x5b   : > { %1025 = vperm.xlu0 %2113, %v911_v26  }
  0x5c   : > { %1030 = vperm.xlu1 %2114, %v912_v27  }
  0x5d   : > { %2018 = vmatmul.mubr.msk.bf16.vlgmr.msra.gmra.mrb[0].mxu0 %vm449_vm0, %v2124_v23 }
  0x5e   : > { %2021 = vmatprep.mubr.msk.bf16.mxu0 %vm449_vm0, %v2125_v25 }
  0x5f   : > { %1035 = vperm.xlu0 %2113, %v913_v28  }
  0x60   : > { %1470 = vperm.xlu1 %2114, %v1436_v30  }
  0x63   : > { %1475 = vperm.xlu0 %2113, %v1437_v32  }
  0x64   : > { %1480 = vperm.xlu1 %2114, %v1438_v33  }
  0x65   : > { %2022 = vmatmul.mubr.msk.bf16.gmra.mrb[4].mxu0 %vm449_vm0, %v2126_v29 }
  0x66   : > { %2025 = vmatprep.mubr.msk.bf16.mxu0 %vm449_vm0, %v2127_v31 }
  0x67   : > { %1485 = vperm.xlu0 %2113, %v1439_v34  }
  0x68   : > { %1490 = vperm.xlu1 %2114, %v1440_v36  }
  0x6b   : > { %1495 = vperm.xlu0 %2113, %v1441_v38  }
  0x6c   : > { %1500 = vperm.xlu1 %2114, %v1442_v39  }
  0x6d   : > { %2026 = vmatmul.mubr.msk.bf16.gmra.mrb[8].mxu0 %vm449_vm0, %v2128_v35 }
  0x6e   : > { %2029 = vmatprep.mubr.msk.bf16.mxu0 %vm449_vm0, %v2129_v37 }
  0x6f   : > { %1505 = vperm.xlu0 %2113, %v1443_v40  }
  0x70   : > { %1510 = vperm.xlu1 %2114, %v1444_v42  }
  0x73   : > { %1515 = vperm.xlu0 %2113, %v1445_v44  }
  0x74   : > { %1520 = vperm.xlu1 %2114, %v1446_v45  }
  0x75   : > { %2030 = vmatmul.mubr.msk.bf16.gmra.mrb[12].mxu0 %vm449_vm0, %v2130_v41 }
  0x76   : > { %2033 = vmatprep.mubr.msk.bf16.mxu0 %vm449_vm0, %v2131_v43 }
  0x77   : > { %1525 = vperm.xlu0 %2113, %v1447_v46  }
  0x78   : > { %1530 = vperm.xlu1 %2114, %v1448_v48  }
  0x7b   : > { %1535 = vperm.xlu0 %2113, %v1449_v50  }
  0x7c   : > { %1540 = vperm.xlu1 %2114, %v1450_v51  }
  0x7d   : > { %2034 = vmatmul.mubr.msk.bf16.gmra.mrb[16].mxu0 %vm449_vm0, %v2132_v47 }
  0x7e   : > { %2037 = vmatprep.mubr.msk.bf16.mxu0 %vm449_vm0, %v2133_v49 }
  0x7f   : > { %1545 = vperm.xlu0 %2113, %v1451_v52  }
  0x80   : > { %1550 = vperm.xlu1 %2114, %v1452_v54  }
  0x83   : > { %1555 = vperm.xlu0 %2113, %v1453_v56  }
  0x84   : > { %1560 = vperm.xlu1 %2114, %v1454_v57  }
  0x85   : > { %2038 = vmatmul.mubr.msk.bf16.gmra.mrb[20].mxu0 %vm449_vm0, %v2134_v53 }
  0x86   : > { %2041 = vmatprep.mubr.msk.bf16.mxu0 %vm449_vm0, %v2135_v55 }
  0x87   : > { %1565 = vperm.xlu0 %2113, %v1455_v58  }
  0x88   : > { %1570 = vperm.xlu1 %2114, %v1456_v60  }
  0x8b   : > { %1040 = vperm.xlu0 %2113, %v914_v62  }
  0x8c   : > { %1575 = vperm.xlu1 %2114, %v1457_v63  }
  0x8d   : > { %2042 = vmatmul.mubr.msk.bf16.gmra.mrb[24].mxu0 %vm449_vm0, %v2136_v59 }
  0x8e   : > { %2045 = vmatprep.mubr.msk.bf16.mxu0 %vm449_vm0, %v2137_v61 }
  0x8f   : > { %1045 = vperm.xlu0 %2113, %v915_v0  }
  0x90   : > { %1580 = vperm.xlu1 %2114, %v1458_v2  }
  0x92   : > { %v790_v38 = vpop.permute.xlu0 %789 }
  0x93   : > { %1050 = vperm.xlu0 %2113, %v916_v3   ;;  %v795_v42 = vpop.permute.xlu1 %794 }
  0x94   : > { %1585 = vperm.xlu1 %2114, %v1459_v5  }
  0x95   : > { %2046 = vmatmul.mubr.msk.bf16.gmra.mrb[28].mxu0 %vm449_vm0, %v2138_v1 }
  0x96   : > { %1275 = vmatprep.mubr.bf16.mxu0 %v2141_v21  ;;  %v750_v44 = vpop.permute.xlu0 %749 }
  0x97   : > { %1055 = vperm.xlu0 %2113, %v917_v6   ;;  %v755_v49 = vpop.permute.xlu1 %754 }
  0x98   : > { %1590 = vperm.xlu1 %2114, %v1460_v7  }
  0x9a   : > { %v800_v51 = vpop.permute.xlu0 %799 }
  0x9b   : > { %1060 = vperm.xlu0 %2113, %v918_v8   ;;  %v760_v54 = vpop.permute.xlu1 %759 }
  0x9c   : > { %1595 = vperm.xlu1 %2114, %v1461_v9  }
  0x9e   : > { %v805_v59 = vpop.permute.xlu0 %804 }
  0x9f   : > { %1065 = vperm.xlu0 %2113, %v919_v10   ;;  %v765_v63 = vpop.permute.xlu1 %764 }
  0xa0   : > { %1600 = vperm.xlu1 %2114, %v1462_v11  }
  0xa2   : > { %v810_v8 = vpop.permute.xlu0 %809 }
  0xa3   : > { %1070 = vperm.xlu0 %2113, %v920_v12  }
  0xa4   : > { %1605 = vperm.xlu1 %2114, %v1463_v13  }
  0xa7   : > { %1075 = vperm.xlu0 %2113, %v921_v14   ;;  %v770_v14 = vpop.permute.xlu1 %769 }
  0xa8   : > { %1610 = vperm.xlu1 %2114, %v1464_v15  }
  0xab   : > { %1080 = vperm.xlu0 %2113, %v922_v16  }
  0xac   : > { %1615 = vperm.xlu1 %2114, %v1465_v17  }
  0xaf   : > { %1620 = vperm.xlu0 %2113, %v1466_v18  }
  0xb0   : > { %1625 = vperm.xlu1 %2114, %v1467_v19   ;;  %v815_v19 = vpop.permute.xlu0 %814 }
  0xb3   : > { %1700 = vperm.xlu0 %2113, %v1697_v20  }
 0x130   : > { %v2019_v23 = vpop.f32.mrb[0].mxu0 }
 0x131   : > { %v556_v24 = vpop.f32.mrb[1].mxu0 }
 0x132   : > { %v2020_v25 = vpop.f32.mrb[2].mxu0 }
 0x133   : > { %v684_v26 = vpack.c.bf16 %v2020_v25, %v2019_v23  ;;  %v559_v27 = vpop.f32.mrb[3].mxu0 }
 0x134   : > { %v683_v28 = vpack.c.bf16 %v559_v27, %v556_v24  ;;  %v775_v27 = vpop.permute.xlu1 %774 }
 0x135   : > { %v828_v2 = vadd.bf16 %v755_v49, %v684_v26 }
 0x136   : > { %v827_v60 = vadd.bf16 %v750_v44, %v683_v28 }
 0x137   : > { %v844_v12 = vmax.bf16 %v2255_v4, %v828_v2  ;;  %v2159_v2 = vld [vmem:[%s2987_s3 + $0x60] ss:$8 sps:$4 sm:$0xff]  }
 0x138   : > { %v2738_v29 = vpop.f32.mrb[4].mxu0  ;;  %v843_v3 = vmax.bf16 %v2255_v4, %v827_v60 }
 0x139   : > { %v572_v30 = vpop.f32.mrb[5].mxu0 }
 0x13a   : > { %v2024_v31 = vpop.f32.mrb[6].mxu0 }
 0x13b   : > { %v686_v32 = vpack.c.bf16 %v2024_v31, %v2738_v29  ;;  %v575_v33 = vpop.f32.mrb[7].mxu0 }
 0x13c   : > { %v685_v34 = vpack.c.bf16 %v575_v33, %v572_v30  ;;  %v820_v33 = vpop.permute.xlu0 %819 }
 0x13d   : > { %v830_v20 = vadd.bf16 %v765_v63, %v686_v32  ;;  %v2154_v63 = vld [vmem:[%s2987_s3 + $0x54] ss:$8 sps:$4 sm:$0xff]  }
 0x13e   : > { %v829_v13 = vadd.bf16 %v760_v54, %v685_v34 }
 0x13f   : > { %v846_v29 = vmax.bf16 %v2255_v4, %v830_v20  ;;  %v2184_v20 = vld [vmem:[%s2987_s3 + $0xf4] ss:$8 sps:$4 sm:$0xff]  }
 0x140   : > { %v2741_v35 = vpop.f32.mrb[8].mxu0  ;;  %v845_v21 = vmax.bf16 %v2255_v4, %v829_v13  ;;  %v825_v54 = vpop.permute.xlu0 %824  ;;  %v2174_v13 = vld [vmem:[%s2987_s3 + $0xb0] ss:$8 sps:$4 sm:$0xff]  }
 0x141   : > { %v2743_v36 = vpop.f32.mrb[9].mxu0 }
 0x142   : > { %v2745_v37 = vpop.f32.mrb[10].mxu0 }
 0x143   : > { %v688_v39 = vpack.c.bf16 %v2745_v37, %v2741_v35  ;;  %v2749_v40 = vpop.f32.mrb[11].mxu0 }
 0x144   : > { %v687_v41 = vpack.c.bf16 %v2749_v40, %v2743_v36 }
 0x146   : > { %v831_v30 = vadd.bf16 %v770_v14, %v687_v41  ;;  %v2175_v14 = vld [vmem:[%s2987_s3 + $0xc4] ss:$8 sps:$4 sm:$0xff]  }
 0x148   : > { %v2753_v43 = vpop.f32.mrb[12].mxu0  ;;  %v847_v44 = vmax.bf16 %v2255_v4, %v831_v30 }
 0x149   : > { %v2755_v45 = vpop.f32.mrb[13].mxu0 }
 0x14a   : > { %v2757_v46 = vpop.f32.mrb[14].mxu0 }
 0x14b   : > { %v690_v47 = vpack.c.bf16 %v2757_v46, %v2753_v43  ;;  %v2761_v48 = vpop.f32.mrb[15].mxu0  ;;  %v2142_v43 = vld [vmem:[%s2987_s3 + $0x20] ss:$8 sps:$4 sm:$0xff]   ;;  %v2145_v46 = vld [vmem:[%s2987_s3 + $0x14] ss:$8 sps:$4 sm:$0xff]  }
 0x14c   : > { %v689_v50 = vpack.c.bf16 %v2761_v48, %v2755_v45  ;;  %v2139_v48 = vld [vmem:[%s2987_s3] ss:$8 sps:$4 sm:$0xff]  }
 0x150   : > { %v2035_v52 = vpop.f32.mrb[16].mxu0 }
 0x151   : > { %v620_v53 = vpop.f32.mrb[17].mxu0 }
 0x152   : > { %v2036_v55 = vpop.f32.mrb[18].mxu0 }
 0x153   : > { %v692_v56 = vpack.c.bf16 %v2036_v55, %v2035_v52  ;;  %v623_v57 = vpop.f32.mrb[19].mxu0 }
 0x154   : > { %v691_v58 = vpack.c.bf16 %v623_v57, %v620_v53 }
 0x155   : > { %v836_v61 = vadd.bf16 %v795_v42, %v692_v56  ;;  %v832_v42 = vadd.bf16 %v775_v27, %v688_v39 }
 0x156   : > { %v835_v62 = vadd.bf16 %v790_v38, %v691_v58 }
 0x157   : > { %v852_v7 = vmax.bf16 %v2255_v4, %v836_v61  ;;  %v848_v35 = vmax.bf16 %v2255_v4, %v832_v42  ;;  %v2151_v61 = vld [vmem:[%s2987_s3 + $0x44] ss:$8 sps:$4 sm:$0xff]  }
 0x158   : > { %v2039_v0 = vpop.f32.mrb[20].mxu0  ;;  %v851_v1 = vmax.bf16 %v2255_v4, %v835_v62  ;;  %v2153_v62 = vld [vmem:[%s2987_s3 + $0x40] ss:$8 sps:$4 sm:$0xff]  }
 0x159   : > { %v636_v5 = vpop.f32.mrb[21].mxu0 }
 0x15a   : > { %v2040_v6 = vpop.f32.mrb[22].mxu0  ;;  %1889 = vmatprep.subr.bf16.mxu0 %v851_v1  ;;  %2049 = vmatprep.subr.bf16.mxu1 %v851_v1  ;;  %v2157_v1 = vld [vmem:[%s2987_s3 + $0x64] ss:$8 sps:$4 sm:$0xff]  }
 0x15b   : > { %v694_v9 = vpack.c.bf16 %v2040_v6, %v2039_v0  ;;  %v639_v10 = vpop.f32.mrb[23].mxu0  ;;  %1890 = vmatpush3.bf16.msra.mxu0 %v843_v3  ;;  %2057 = vmatpush3.bf16.msra.mxu1 %v843_v3  ;;  %v2156_v0 = vld [vmem:[%s2987_s3 + $0x50] ss:$8 sps:$4 sm:$0xff]   ;;  %v2160_v3 = vld [vmem:[%s2987_s3 + $0x74] ss:$8 sps:$4 sm:$0xff]  }
 0x15c   : > { %v693_v11 = vpack.c.bf16 %v639_v10, %v636_v5  ;;  %1891 = vmatprep.subr.bf16.mxu0 %v852_v7  ;;  %2050 = vmatprep.subr.bf16.mxu1 %v852_v7  ;;  %v2162_v5 = vld [vmem:[%s2987_s3 + $0x70] ss:$8 sps:$4 sm:$0xff]   ;;  %v2163_v6 = vld [vmem:[%s2987_s3 + $0x84] ss:$8 sps:$4 sm:$0xff]   ;;  %v2165_v7 = vld [vmem:[%s2987_s3 + $0x80] ss:$8 sps:$4 sm:$0xff]  }
 0x15d   : > { %v838_v15 = vadd.bf16 %v805_v59, %v694_v9  ;;  %v2168_v9 = vld [vmem:[%s2987_s3 + $0x90] ss:$8 sps:$4 sm:$0xff]   ;;  %v2169_v10 = vld [vmem:[%s2987_s3 + $0xa4] ss:$8 sps:$4 sm:$0xff]  }
 0x15e   : > { %v837_v16 = vadd.bf16 %v800_v51, %v693_v11  ;;  %v780_v51 = vpop.permute.xlu1 %779  ;;  %v2171_v11 = vld [vmem:[%s2987_s3 + $0xa0] ss:$8 sps:$4 sm:$0xff]  }
 0x15f   : > { %1892 = vmatpush3.bf16.msra.mxu0 %v844_v12  ;;  %2058 = vmatpush3.bf16.msra.mxu1 %v844_v12  ;;  %v854_v24 = vmax.bf16 %v2255_v4, %v838_v15  ;;  %v833_v37 = vadd.bf16 %v780_v51, %v689_v50  ;;  %v2150_v50 = vld [vmem:[%s2987_s3 + $0x30] ss:$8 sps:$4 sm:$0xff]   ;;  %v2172_v12 = vld [vmem:[%s2987_s3 + $0xb4] ss:$8 sps:$4 sm:$0xff]   ;;  %v2177_v15 = vld [vmem:[%s2987_s3 + $0xc0] ss:$8 sps:$4 sm:$0xff]  }
 0x160   : > { %v2043_v17 = vpop.f32.mrb[24].mxu0  ;;  %v853_v18 = vmax.bf16 %v2255_v4, %v837_v16  ;;  %v2178_v16 = vld [vmem:[%s2987_s3 + $0xd4] ss:$8 sps:$4 sm:$0xff]  }
 0x161   : > { %v652_v22 = vpop.f32.mrb[25].mxu0  ;;  %v849_v59 = vmax.bf16 %v2255_v4, %v833_v37 }
 0x162   : > { %v2044_v23 = vpop.f32.mrb[26].mxu0  ;;  %1893 = vmatprep.subr.bf16.mxu0 %v853_v18  ;;  %2051 = vmatprep.subr.bf16.mxu1 %v853_v18  ;;  %v785_v56 = vpop.permute.xlu1 %784  ;;  %v2181_v18 = vld [vmem:[%s2987_s3 + $0xe4] ss:$8 sps:$4 sm:$0xff]  }
 0x163   : > { %v696_v25 = vpack.c.bf16 %v2044_v23, %v2043_v17  ;;  %v655_v26 = vpop.f32.mrb[27].mxu0  ;;  %1894 = vmatpush3.bf16.msra.mxu0 %v845_v21  ;;  %2059 = vmatpush3.bf16.msra.mxu1 %v845_v21  ;;  %v834_v58 = vadd.bf16 %v785_v56, %v690_v47  ;;  %v2147_v47 = vld [vmem:[%s2987_s3 + $0x34] ss:$8 sps:$4 sm:$0xff]   ;;  %v2180_v17 = vld [vmem:[%s2987_s3 + $0xd0] ss:$8 sps:$4 sm:$0xff]  }
 0x164   : > { %v695_v28 = vpack.c.bf16 %v655_v26, %v652_v22  ;;  %1895 = vmatprep.subr.bf16.mxu0 %v854_v24  ;;  %2052 = vmatprep.subr.bf16.mxu1 %v854_v24  ;;  %v2186_v21 = vld [vmem:[%s2987_s3 + $0xf0] ss:$8 sps:$4 sm:$0xff]   ;;  %v926_v22 = vpop.permute.xlu0 %925 }
 0x165   : > { %v840_v31 = vadd.bf16 %v815_v19, %v696_v25  ;;  %v850_v45 = vmax.bf16 %v2255_v4, %v834_v58  ;;  %v2183_v19 = vld [vmem:[%s2987_s3 + $0xe0] ss:$8 sps:$4 sm:$0xff]  }
 0x166   : > { %v839_v32 = vadd.bf16 %v810_v8, %v695_v28  ;;  %v2166_v8 = vld [vmem:[%s2987_s3 + $0x94] ss:$8 sps:$4 sm:$0xff]   ;;  %v931_v23 = vpop.permute.xlu1 %930 }
 0x167   : > { %1896 = vmatpush3.bf16.msra.mxu0 %v846_v29  ;;  %2060 = vmatpush3.bf16.msra.mxu1 %v846_v29  ;;  %v856_v36 = vmax.bf16 %v2255_v4, %v840_v31 }
 0x168   : > { %v2047_v34 = vpop.f32.mrb[28].mxu0  ;;  %v855_v38 = vmax.bf16 %v2255_v4, %v839_v32  ;;  %v936_v24 = vpop.permute.xlu0 %935 }
 0x169   : > { %v668_v49 = vpop.f32.mrb[29].mxu0 }
 0x16a   : > { %v2048_v52 = vpop.f32.mrb[30].mxu0  ;;  %1897 = vmatprep.subr.bf16.mxu0 %v855_v38  ;;  %2053 = vmatprep.subr.bf16.mxu1 %v855_v38  ;;  %v2883_v25 = vpop.permute.xlu1 %940 }
 0x16b   : > { %v698_v40 = vpack.c.bf16 %v2048_v52, %v2047_v34  ;;  %v671_v41 = vpop.f32.mrb[31].mxu0  ;;  %1898 = vmatpush3.bf16.msra.mxu0 %v847_v44  ;;  %2061 = vmatpush3.bf16.msra.mxu1 %v847_v44 }
 0x16c   : > { %v697_v53 = vpack.c.bf16 %v671_v41, %v668_v49  ;;  %1899 = vmatprep.subr.bf16.mxu0 %v856_v36  ;;  %2054 = vmatprep.subr.bf16.mxu1 %v856_v36  ;;  %v946_v26 = vpop.permute.xlu0 %945 }
 0x16d   : > { %v842_v39 = vadd.bf16 %v825_v54, %v698_v40 }
 0x16e   : > { %v841_v55 = vadd.bf16 %v820_v33, %v697_v53  ;;  %v951_v27 = vpop.permute.xlu1 %950 }
 0x16f   : > { %1900 = vmatpush3.bf16.msra.mxu0 %v848_v35  ;;  %2062 = vmatpush3.bf16.msra.mxu1 %v848_v35  ;;  %v858_v60 = vmax.bf16 %v2255_v4, %v842_v39 }
 0x170   : > { %v857_v57 = vmax.bf16 %v2255_v4, %v841_v55  ;;  %v2149_v4 = vld [vmem:[%s2987_s3 + $0x10] ss:$8 sps:$4 sm:$0xff]   ;;  %v2885_v28 = vpop.permute.xlu0 %955 }
 0x172   : > { %1901 = vmatprep.subr.bf16.mxu0 %v857_v57  ;;  %2055 = vmatprep.subr.bf16.mxu1 %v857_v57  ;;  %v2887_v29 = vpop.permute.xlu1 %960 }
 0x173   : > { %1902 = vmatpush3.bf16.msra.mxu0 %v849_v59  ;;  %2063 = vmatpush3.bf16.msra.mxu1 %v849_v59 }
 0x174   : > { %1903 = vmatprep.subr.bf16.mxu0 %v858_v60  ;;  %2056 = vmatprep.subr.bf16.mxu1 %v858_v60  ;;  %v2889_v30 = vpop.permute.xlu0 %965 }
 0x176   : > { %v2891_v31 = vpop.permute.xlu1 %970 }
 0x177   : > { %1904 = vmatpush3.bf16.msra.mxu0 %v850_v45  ;;  %2064 = vmatpush3.bf16.msra.mxu1 %v850_v45 }
 0x178   : > { %v2893_v32 = vpop.permute.xlu0 %975 }
 0x17a   : > { %1276 = vmatmul.mubr.bf16.vlgmr.msra.gmra.mrb[32].mxu0 %v2139_v48  ;;  %1292 = vmatmul.mubr.bf16.vlgmr.msra.gmra.mrb[0].mxu1 %v2142_v43  ;;  %v2895_v33 = vpop.permute.xlu1 %980 }
 0x17b   : > { %1283 = vmatprep.mubr.bf16.mxu0 %v2145_v46  ;;  %1299 = vmatprep.mubr.bf16.mxu1 %v2147_v47 }
 0x17c   : > { %v2897_v34 = vpop.permute.xlu0 %985 }
 0x17e   : > { %v2899_v38 = vpop.permute.xlu1 %990 }
 0x180   : > { %v2901_v42 = vpop.permute.xlu0 %995 }
 0x182   : > { %1284 = vmatmul.mubr.bf16.gmra.mrb[36].mxu0 %v2149_v4  ;;  %1300 = vmatmul.mubr.bf16.gmra.mrb[4].mxu1 %v2150_v50  ;;  %v2903_v44 = vpop.permute.xlu1 %1000 }
 0x183   : > { %1307 = vmatprep.mubr.bf16.mxu1 %v2151_v61 }
 0x184   : > { %v2905_v49 = vpop.permute.xlu0 %1005 }
 0x186   : > { %v2907_v51 = vpop.permute.xlu1 %1010 }
 0x188   : > { %v2909_v52 = vpop.permute.xlu0 %1015 }
 0x18a   : > { %1308 = vmatmul.mubr.bf16.gmra.mrb[8].mxu1 %v2153_v62  ;;  %v2911_v36 = vpop.permute.xlu1 %1020 }
 0x18b   : > { %1315 = vmatprep.mubr.bf16.mxu1 %v2154_v63 }
 0x18c   : > { %v2913_v40 = vpop.permute.xlu0 %1025 }
 0x18e   : > { %v2915_v41 = vpop.permute.xlu1 %1030 }
 0x190   : > { %v2917_v53 = vpop.permute.xlu0 %1035 }
 0x192   : > { %1316 = vmatmul.mubr.bf16.gmra.mrb[12].mxu1 %v2156_v0  ;;  %v1471_v54 = vpop.permute.xlu1 %1470 }
 0x193   : > { %1323 = vmatprep.mubr.bf16.mxu1 %v2157_v1 }
 0x194   : > { %v1476_v35 = vpop.permute.xlu0 %1475 }
 0x196   : > { %v1481_v37 = vpop.permute.xlu1 %1480 }
 0x198   : > { %v1486_v39 = vpop.permute.xlu0 %1485 }
 0x19a   : > { %1324 = vmatmul.mubr.bf16.gmra.mrb[16].mxu1 %v2159_v2  ;;  %v1491_v55 = vpop.permute.xlu1 %1490 }
 0x19b   : > { %1331 = vmatprep.mubr.bf16.mxu1 %v2160_v3 }
 0x19c   : > { %v1496_v0 = vpop.permute.xlu0 %1495 }
 0x19e   : > { %v1501_v1 = vpop.permute.xlu1 %1500 }
 0x1a2   : > { %1332 = vmatmul.mubr.bf16.gmra.mrb[20].mxu1 %v2162_v5 }
 0x1a3   : > { %1339 = vmatprep.mubr.bf16.mxu1 %v2163_v6 }
 0x1aa   : > { %1340 = vmatmul.mubr.bf16.gmra.mrb[24].mxu1 %v2165_v7 }
 0x1ab   : > { %1347 = vmatprep.mubr.bf16.mxu1 %v2166_v8 }
 0x1b2   : > { %1348 = vmatmul.mubr.bf16.gmra.mrb[28].mxu1 %v2168_v9 }
 0x1b3   : > { %1355 = vmatprep.mubr.bf16.mxu1 %v2169_v10 }
 0x1ba   : > { %1356 = vmatmul.mubr.bf16.gmra.mrb[32].mxu1 %v2171_v11 }
 0x1bb   : > { %1363 = vmatprep.mubr.bf16.mxu1 %v2172_v12 }
 0x1c2   : > { %1364 = vmatmul.mubr.bf16.gmra.mrb[36].mxu1 %v2174_v13 }
 0x1c3   : > { %1371 = vmatprep.mubr.bf16.mxu1 %v2175_v14 }
 0x1ca   : > { %1372 = vmatmul.mubr.bf16.gmra.mrb[40].mxu1 %v2177_v15 }
 0x1cb   : > { %1379 = vmatprep.mubr.bf16.mxu1 %v2178_v16 }
 0x1d2   : > { %1380 = vmatmul.mubr.bf16.gmra.mrb[44].mxu1 %v2180_v17 }
 0x1d3   : > { %1387 = vmatprep.mubr.bf16.mxu1 %v2181_v18 }
 0x1da   : > { %1388 = vmatmul.mubr.bf16.gmra.mrb[48].mxu1 %v2183_v19 }
 0x1db   : > { %1395 = vmatprep.mubr.bf16.mxu1 %v2184_v20 }
 0x1e2   : > { %1396 = vmatmul.mubr.bf16.gmra.mrb[52].mxu1 %v2186_v21 }
 0x24d   : > { %v1905_v56 = vpop.f32.mrb[32].mxu0  ;;  %v1917_v57 = vpop.f32.mrb[0].mxu1 }
 0x24e   : > { %v1906_v58 = vpop.f32.mrb[33].mxu0  ;;  %v1918_v59 = vpop.f32.mrb[1].mxu1 }
 0x24f   : > { %v1907_v60 = vadd.f32 %v1906_v58, %v1905_v56  ;;  %v1919_v45 = vadd.f32 %v1918_v59, %v1917_v57  ;;  %v1908_v48 = vpop.f32.mrb[34].mxu0  ;;  %v1920_v43 = vpop.f32.mrb[2].mxu1 }
 0x250   : > { %v1909_v46 = vpop.f32.mrb[35].mxu0  ;;  %v1921_v47 = vpop.f32.mrb[3].mxu1 }
 0x251   : > { %v1278_v4 = vadd.f32 %v1907_v60, %v926_v22  ;;  %v1910_v50 = vadd.f32 %v1909_v46, %v1908_v48  ;;  %v1922_v61 = vadd.f32 %v1921_v47, %v1920_v43  ;;  %v1294_v14 = vadd.f32 %v1919_v45, %v946_v26  ;;  %v1506_v22 = vpop.permute.xlu0 %1505  ;;  %v1511_v57 = vpop.permute.xlu1 %1510 }
 0x253   : > { %v1404_v62 = vmax.f32 %v1278_v4, 0.0  ;;  %v1281_v63 = vadd.f32 %v1910_v50, %v931_v23  ;;  %v1297_v20 = vadd.f32 %v1922_v61, %v951_v27  ;;  %v1408_v58 = vmax.f32 %v1294_v14, 0.0 }
 0x255   : > { %v1405_v2 = vmax.f32 %v1281_v63, 0.0  ;;  %v1911_v3 = vpop.f32.mrb[36].mxu0  ;;  %v1923_v5 = vpop.f32.mrb[4].mxu1  ;;  %v1628_v8 = vmul.f32 %v1471_v54, %v1404_v62  ;;  %v1409_v48 = vmax.f32 %v1297_v20, 0.0  ;;  %v1632_v47 = vmul.f32 %v1491_v55, %v1408_v58 }
 0x256   : > { %v1912_v6 = vpop.f32.mrb[37].mxu0  ;;  %v1924_v7 = vpop.f32.mrb[5].mxu1 }
 0x257   : > { %v1629_v9 = vmul.f32 %v1476_v35, %v1405_v2  ;;  %v1913_v10 = vadd.f32 %v1912_v6, %v1911_v3  ;;  %v1925_v11 = vadd.f32 %v1924_v7, %v1923_v5  ;;  %v1914_v12 = vpop.f32.mrb[38].mxu0  ;;  %v1926_v13 = vpop.f32.mrb[6].mxu1 }
 0x258   : > { %v1915_v15 = vpop.f32.mrb[39].mxu0  ;;  %v1927_v16 = vpop.f32.mrb[7].mxu1 }
 0x259   : > { %v1660_v17 = vadd.f32 %v1629_v9, %v1628_v8  ;;  %v1286_v18 = vadd.f32 %v1913_v10, %v936_v24  ;;  %v1916_v19 = vadd.f32 %v1915_v15, %v1914_v12  ;;  %v1928_v21 = vadd.f32 %v1927_v16, %v1926_v13  ;;  %v1516_v50 = vpop.permute.xlu0 %1515  ;;  %v1521_v63 = vpop.permute.xlu1 %1520 }
 0x25a   : > { %v1302_v35 = vadd.f32 %v1925_v11, %v2885_v28  ;;  %v1633_v28 = vmul.f32 %v1496_v0, %v1409_v48 }
 0x25b   : > { %v1406_v23 = vmax.f32 %v1286_v18, 0.0  ;;  %v1289_v56 = vadd.f32 %v1916_v19, %v2883_v25  ;;  %v1305_v24 = vadd.f32 %v1928_v21, %v2887_v29 }
 0x25c   : > { %v1410_v61 = vmax.f32 %v1302_v35, 0.0 }
 0x25d   : > { %v1630_v54 = vmul.f32 %v1481_v37, %v1406_v23  ;;  %v1407_v59 = vmax.f32 %v1289_v56, 0.0  ;;  %v1929_v60 = vpop.f32.mrb[8].mxu1  ;;  %v1411_v3 = vmax.f32 %v1305_v24, 0.0  ;;  %v1526_v9 = vpop.permute.xlu0 %1525 }
 0x25e   : > { %v1930_v26 = vpop.f32.mrb[9].mxu1  ;;  %v1634_v6 = vmul.f32 %v1501_v1, %v1410_v61  ;;  %v1531_v14 = vpop.permute.xlu1 %1530 }
 0x25f   : > { %v1661_v45 = vadd.f32 %v1660_v17, %v1630_v54  ;;  %v1631_v43 = vmul.f32 %v1486_v39, %v1407_v59  ;;  %v1931_v46 = vadd.f32 %v1930_v26, %v1929_v60  ;;  %v1932_v27 = vpop.f32.mrb[10].mxu1  ;;  %v1635_v55 = vmul.f32 %v1506_v22, %v1411_v3 }
 0x260   : > { %v1933_v4 = vpop.f32.mrb[11].mxu1 }
 0x261   : > { %v1662_v25 = vadd.f32 %v1661_v45, %v1631_v43  ;;  %v1310_v62 = vadd.f32 %v1931_v46, %v2889_v30  ;;  %v1934_v37 = vadd.f32 %v1933_v4, %v1932_v27  ;;  %v1536_v20 = vpop.permute.xlu0 %1535 }
 0x262   : > { %v1541_v58 = vpop.permute.xlu1 %1540 }
 0x263   : > { %v1663_v2 = vadd.f32 %v1662_v25, %v1632_v47  ;;  %v1313_v5 = vadd.f32 %v1934_v37, %v2891_v31  ;;  %v1412_v7 = vmax.f32 %v1310_v62, 0.0 }
 0x265   : > { %v1664_v39 = vadd.f32 %v1663_v2, %v1633_v28  ;;  %v1935_v29 = vpop.f32.mrb[12].mxu1  ;;  %v1413_v11 = vmax.f32 %v1313_v5, 0.0  ;;  %v1636_v16 = vmul.f32 %v1511_v57, %v1412_v7  ;;  %v1546_v43 = vpop.permute.xlu0 %1545 }
 0x266   : > { %v1936_v8 = vpop.f32.mrb[13].mxu1  ;;  %v1551_v46 = vpop.permute.xlu1 %1550 }
 0x267   : > { %v1665_v10 = vadd.f32 %v1664_v39, %v1634_v6  ;;  %v1937_v12 = vadd.f32 %v1936_v8, %v1935_v29  ;;  %v1938_v13 = vpop.f32.mrb[14].mxu1  ;;  %v1637_v31 = vmul.f32 %v1516_v50, %v1413_v11 }
 0x268   : > { %v1939_v30 = vpop.f32.mrb[15].mxu1 }
 0x269   : > { %v1666_v15 = vadd.f32 %v1665_v10, %v1635_v55  ;;  %v1318_v0 = vadd.f32 %v1937_v12, %v2893_v32  ;;  %v1940_v17 = vadd.f32 %v1939_v30, %v1938_v13  ;;  %v1556_v28 = vpop.permute.xlu0 %1555 }
 0x26a   : > { %v1561_v5 = vpop.permute.xlu1 %1560 }
 0x26b   : > { %v1667_v18 = vadd.f32 %v1666_v15, %v1636_v16  ;;  %v1414_v1 = vmax.f32 %v1318_v0, 0.0  ;;  %v1321_v19 = vadd.f32 %v1940_v17, %v2895_v33 }
 0x26d   : > { %v1668_v21 = vadd.f32 %v1667_v18, %v1637_v31  ;;  %v1638_v23 = vmul.f32 %v1521_v63, %v1414_v1  ;;  %v1415_v22 = vmax.f32 %v1321_v19, 0.0  ;;  %v1941_v56 = vpop.f32.mrb[16].mxu1 }
 0x26e   : > { %v1942_v54 = vpop.f32.mrb[17].mxu1  ;;  %v1571_v13 = vpop.permute.xlu1 %1570 }
 0x26f   : > { %v1669_v35 = vadd.f32 %v1668_v21, %v1638_v23  ;;  %v1639_v59 = vmul.f32 %v1526_v9, %v1415_v22  ;;  %v1943_v60 = vadd.f32 %v1942_v54, %v1941_v56  ;;  %v1944_v48 = vpop.f32.mrb[18].mxu1  ;;  %v1566_v9 = vpop.permute.xlu0 %1565 }
 0x270   : > { %v1945_v57 = vpop.f32.mrb[19].mxu1 }
 0x271   : > { %v1670_v26 = vadd.f32 %v1669_v35, %v1639_v59  ;;  %v1326_v32 = vadd.f32 %v1943_v60, %v2897_v34  ;;  %v1946_v45 = vadd.f32 %v1945_v57, %v1944_v48 }
 0x272   : > { %v1576_v1 = vpop.permute.xlu1 %1575 }
 0x273   : > { %v1416_v24 = vmax.f32 %v1326_v32, 0.0  ;;  %v1329_v33 = vadd.f32 %v1946_v45, %v2899_v38  ;;  %v1041_v17 = vpop.permute.xlu0 %1040 }
 0x275   : > { %v1640_v27 = vmul.f32 %v1531_v14, %v1416_v24  ;;  %v1417_v47 = vmax.f32 %v1329_v33, 0.0  ;;  %v1947_v4 = vpop.f32.mrb[20].mxu1 }
 0x276   : > { %v1948_v50 = vpop.f32.mrb[21].mxu1 }
 0x277   : > { %v1671_v61 = vadd.f32 %v1670_v26, %v1640_v27  ;;  %v1641_v25 = vmul.f32 %v1536_v20, %v1417_v47  ;;  %v1949_v62 = vadd.f32 %v1948_v50, %v1947_v4  ;;  %v1950_v37 = vpop.f32.mrb[22].mxu1 }
 0x278   : > { %v1951_v63 = vpop.f32.mrb[23].mxu1 }
 0x279   : > { %v1672_v2 = vadd.f32 %v1671_v61, %v1641_v25  ;;  %v1334_v3 = vadd.f32 %v1949_v62, %v2901_v42  ;;  %v1952_v34 = vadd.f32 %v1951_v63, %v1950_v37 }
 0x27b   : > { %v1418_v6 = vmax.f32 %v1334_v3, 0.0  ;;  %v1337_v39 = vadd.f32 %v1952_v34, %v2903_v44 }
 0x27d   : > { %v1642_v38 = vmul.f32 %v1541_v58, %v1418_v6  ;;  %v1419_v7 = vmax.f32 %v1337_v39, 0.0  ;;  %v1953_v29 = vpop.f32.mrb[24].mxu1 }
 0x27e   : > { %v1954_v8 = vpop.f32.mrb[25].mxu1 }
 0x27f   : > { %v1673_v55 = vadd.f32 %v1672_v2, %v1642_v38  ;;  %v1643_v10 = vmul.f32 %v1546_v43, %v1419_v7  ;;  %v1955_v11 = vadd.f32 %v1954_v8, %v1953_v29  ;;  %v1956_v12 = vpop.f32.mrb[26].mxu1 }
 0x280   : > { %v1957_v14 = vpop.f32.mrb[27].mxu1 }
 0x281   : > { %v1674_v30 = vadd.f32 %v1673_v55, %v1643_v10  ;;  %v1342_v15 = vadd.f32 %v1955_v11, %v2905_v49  ;;  %v1958_v42 = vadd.f32 %v1957_v14, %v1956_v12  ;;  %v1046_v49 = vpop.permute.xlu0 %1045 }
 0x283   : > { %v1420_v16 = vmax.f32 %v1342_v15, 0.0  ;;  %v1345_v0 = vadd.f32 %v1958_v42, %v2907_v51  ;;  %v1581_v51 = vpop.permute.xlu1 %1580 }
 0x285   : > { %v1644_v44 = vmul.f32 %v1551_v46, %v1420_v16  ;;  %v1421_v18 = vmax.f32 %v1345_v0, 0.0  ;;  %v1959_v31 = vpop.f32.mrb[28].mxu1  ;;  %v1051_v27 = vpop.permute.xlu0 %1050 }
 0x286   : > { %v1960_v19 = vpop.f32.mrb[29].mxu1 }
 0x287   : > { %v1675_v20 = vadd.f32 %v1674_v30, %v1644_v44  ;;  %v1645_v21 = vmul.f32 %v1556_v28, %v1421_v18  ;;  %v1961_v23 = vadd.f32 %v1960_v19, %v1959_v31  ;;  %v1962_v22 = vpop.f32.mrb[30].mxu1  ;;  %v1586_v50 = vpop.permute.xlu1 %1585 }
 0x288   : > { %v1963_v56 = vpop.f32.mrb[31].mxu1 }
 0x289   : > { %v1676_v58 = vadd.f32 %v1675_v20, %v1645_v21  ;;  %v1350_v54 = vadd.f32 %v1961_v23, %v2909_v52  ;;  %v1964_v35 = vadd.f32 %v1963_v56, %v1962_v22  ;;  %v1056_v28 = vpop.permute.xlu0 %1055 }
 0x28b   : > { %v1422_v59 = vmax.f32 %v1350_v54, 0.0  ;;  %v1353_v60 = vadd.f32 %v1964_v35, %v2911_v36  ;;  %v1591_v6 = vpop.permute.xlu1 %1590 }
 0x28d   : > { %v1646_v48 = vmul.f32 %v1561_v5, %v1422_v59  ;;  %v1423_v57 = vmax.f32 %v1353_v60, 0.0  ;;  %v1965_v26 = vpop.f32.mrb[32].mxu1 }
 0x28e   : > { %v1966_v32 = vpop.f32.mrb[33].mxu1 }
 0x28f   : > { %v1677_v45 = vadd.f32 %v1676_v58, %v1646_v48  ;;  %v1647_v43 = vmul.f32 %v1566_v9, %v1423_v57  ;;  %v1967_v24 = vadd.f32 %v1966_v32, %v1965_v26  ;;  %v1968_v33 = vpop.f32.mrb[34].mxu1  ;;  %v1061_v9 = vpop.permute.xlu0 %1060 }
 0x290   : > { %v1969_v46 = vpop.f32.mrb[35].mxu1  ;;  %v1596_v11 = vpop.permute.xlu1 %1595 }
 0x291   : > { %v1678_v47 = vadd.f32 %v1677_v45, %v1647_v43  ;;  %v1358_v4 = vadd.f32 %v1967_v24, %v2913_v40  ;;  %v1970_v52 = vadd.f32 %v1969_v46, %v1968_v33 }
 0x293   : > { %v1424_v61 = vmax.f32 %v1358_v4, 0.0  ;;  %v1361_v25 = vadd.f32 %v1970_v52, %v2915_v41  ;;  %v1066_v18 = vpop.permute.xlu0 %1065 }
 0x295   : > { %v1648_v36 = vmul.f32 %v1571_v13, %v1424_v61  ;;  %v1425_v62 = vmax.f32 %v1361_v25, 0.0  ;;  %v1971_v37 = vpop.f32.mrb[36].mxu1 }
 0x296   : > { %v1972_v63 = vpop.f32.mrb[37].mxu1 }
 0x297   : > { %v1679_v2 = vadd.f32 %v1678_v47, %v1648_v36  ;;  %v1649_v3 = vmul.f32 %v1576_v1, %v1425_v62  ;;  %v1973_v34 = vadd.f32 %v1972_v63, %v1971_v37  ;;  %v1974_v5 = vpop.f32.mrb[38].mxu1  ;;  %v1601_v1 = vpop.permute.xlu1 %1600 }
 0x298   : > { %v1975_v39 = vpop.f32.mrb[39].mxu1  ;;  %v1071_v35 = vpop.permute.xlu0 %1070 }
 0x299   : > { %v1680_v38 = vadd.f32 %v1679_v2, %v1649_v3  ;;  %v1366_v7 = vadd.f32 %v1973_v34, %v2917_v53  ;;  %v1976_v40 = vadd.f32 %v1975_v39, %v1974_v5 }
 0x29b   : > { %v1426_v29 = vmax.f32 %v1366_v7, 0.0  ;;  %v1369_v8 = vadd.f32 %v1976_v40, %v1041_v17  ;;  %v1606_v48 = vpop.permute.xlu1 %1605 }
 0x29c   : > { %v1076_v24 = vpop.permute.xlu0 %1075 }
 0x29d   : > { %v1650_v55 = vmul.f32 %v1581_v51, %v1426_v29  ;;  %v1427_v41 = vmax.f32 %v1369_v8, 0.0  ;;  %v1977_v10 = vpop.f32.mrb[40].mxu1 }
 0x29e   : > { %v1978_v12 = vpop.f32.mrb[41].mxu1 }
 0x29f   : > { %v1681_v13 = vadd.f32 %v1680_v38, %v1650_v55  ;;  %v1651_v14 = vmul.f32 %v1586_v50, %v1427_v41  ;;  %v1979_v30 = vadd.f32 %v1978_v12, %v1977_v10  ;;  %v1980_v15 = vpop.f32.mrb[42].mxu1  ;;  %v1611_v4 = vpop.permute.xlu1 %1610 }
 0x2a0   : > { %v1981_v42 = vpop.f32.mrb[43].mxu1  ;;  %v1081_v37 = vpop.permute.xlu0 %1080 }
 0x2a1   : > { %v1682_v16 = vadd.f32 %v1681_v13, %v1651_v14  ;;  %v1374_v0 = vadd.f32 %v1979_v30, %v1046_v49  ;;  %v1982_v44 = vadd.f32 %v1981_v42, %v1980_v15  ;;  %v1703_v30 = vlaneseq }
 0x2a3   : > { %v1428_v31 = vmax.f32 %v1374_v0, 0.0  ;;  %v1377_v53 = vadd.f32 %v1982_v44, %v1051_v27  ;;  %v1616_v3 = vpop.permute.xlu1 %1615 }
 0x2a4   : > { %v1621_v41 = vpop.permute.xlu0 %1620 }
 0x2a5   : > { %v1652_v19 = vmul.f32 %v1591_v6, %v1428_v31  ;;  %v1429_v17 = vmax.f32 %v1377_v53, 0.0  ;;  %v1983_v20 = vpop.f32.mrb[44].mxu1 }
 0x2a6   : > { %v1984_v21 = vpop.f32.mrb[45].mxu1 }
 0x2a7   : > { %v1683_v23 = vadd.f32 %v1682_v16, %v1652_v19  ;;  %v1653_v22 = vmul.f32 %v1596_v11, %v1429_v17  ;;  %v1985_v56 = vadd.f32 %v1984_v21, %v1983_v20  ;;  %v1986_v58 = vpop.f32.mrb[46].mxu1  ;;  %v1626_v12 = vpop.permute.xlu1 %1625  ;;  %v1704_v16 = vshrl.u32 %v1703_v30, 7 }
 0x2a8   : > { %v1987_v54 = vpop.f32.mrb[47].mxu1  ;;  %v1701_v53 = vpop.permute.xlu0 %1700 }
 0x2a9   : > { %v1684_v59 = vadd.f32 %v1683_v23, %v1653_v22  ;;  %v1382_v60 = vadd.f32 %v1985_v56, %v1056_v28  ;;  %v1988_v51 = vadd.f32 %v1987_v54, %v1986_v58 }
 0x2ab   : > { %v1430_v49 = vmax.f32 %v1382_v60, 0.0  ;;  %v1385_v57 = vadd.f32 %v1988_v51, %v1061_v9 }
 0x2ad   : > { %v1654_v26 = vmul.f32 %v1601_v1, %v1430_v49  ;;  %v1431_v32 = vmax.f32 %v1385_v57, 0.0  ;;  %v1989_v45 = vpop.f32.mrb[48].mxu1 }
 0x2ae   : > { %v1990_v43 = vpop.f32.mrb[49].mxu1 }
 0x2af   : > { %v1685_v33 = vadd.f32 %v1684_v59, %v1654_v26  ;;  %v1655_v46 = vmul.f32 %v1606_v48, %v1431_v32  ;;  %v1991_v27 = vadd.f32 %v1990_v43, %v1989_v45  ;;  %v1992_v47 = vpop.f32.mrb[50].mxu1 }
 0x2b0   : > { %v1993_v52 = vpop.f32.mrb[51].mxu1 }
 0x2b1   : > { %v1686_v50 = vadd.f32 %v1685_v33, %v1655_v46  ;;  %v1390_v61 = vadd.f32 %v1991_v27, %v1066_v18  ;;  %v1994_v25 = vadd.f32 %v1993_v52, %v1992_v47  ;;  %v1705_v18 = vsub.s32 0, %v1704_v16 }
 0x2b3   : > { %v1432_v36 = vmax.f32 %v1390_v61, 0.0  ;;  %v1393_v62 = vadd.f32 %v1994_v25, %v1071_v35  ;;  %v1706_v19 = vrot.slane %v1701_v53, %v1705_v18 }
 0x2b5   : > { %v1656_v63 = vmul.f32 %v1611_v4, %v1432_v36  ;;  %v1433_v28 = vmax.f32 %v1393_v62, 0.0  ;;  %v1995_v2 = vpop.f32.mrb[52].mxu1 }
 0x2b6   : > { %v1996_v34 = vpop.f32.mrb[53].mxu1 }
 0x2b7   : > { %v1687_v5 = vadd.f32 %v1686_v50, %v1656_v63  ;;  %v1657_v6 = vmul.f32 %v1616_v3, %v1433_v28  ;;  %v1997_v39 = vadd.f32 %v1996_v34, %v1995_v2  ;;  %v1998_v38 = vpop.f32.mrb[54].mxu1 }
 0x2b8   : > { %v1999_v7 = vpop.f32.mrb[55].mxu1 }
 0x2b9   : > { %v1688_v40 = vadd.f32 %v1687_v5, %v1657_v6  ;;  %v1398_v29 = vadd.f32 %v1997_v39, %v1076_v24  ;;  %v2000_v8 = vadd.f32 %v1999_v7, %v1998_v38 }
 0x2bb   : > { %v1434_v9 = vmax.f32 %v1398_v29, 0.0  ;;  %v1401_v55 = vadd.f32 %v2000_v8, %v1081_v37 }
 0x2bd   : > { %v1658_v10 = vmul.f32 %v1621_v41, %v1434_v9  ;;  %v1435_v11 = vmax.f32 %v1401_v55, 0.0 }
 0x2bf   : > { %v1689_v13 = vadd.f32 %v1688_v40, %v1658_v10  ;;  %v1659_v14 = vmul.f32 %v1626_v12, %v1435_v11 }
 0x2c1   : > { %v1690_v15 = vadd.f32 %v1689_v13, %v1659_v14 }
 0x2c3   : > { %v1691_v42 = vrot.slane %v1690_v15, 4 }
 0x2c5   : > { %v1692_v0 = vadd.f32 %v1691_v42, %v1690_v15 }
 0x2c7   : > { %v1693_v44 = vrot.slane %v1692_v0, 2 }
 0x2c9   : > { %v1694_v31 = vadd.f32 %v1693_v44, %v1692_v0 }
 0x2cb   : > { %v1695_v1 = vrot.slane %v1694_v31, 1 }
 0x2cd   : > { %v1696_v17 = vadd.f32 %v1695_v1, %v1694_v31 }
 0x2cf   : > { %v1707_v20 = vadd.f32 %v1706_v19, %v1696_v17 }
 0x2d1   : > { %v1861_v21 = vmul.f32 -1.442695, %v1707_v20 }
 0x2d3   : > { %2187 = vpow2.f32 %v1861_v21 }
 0x2dd   : > { %v2188_v23 = vpop.eup %2187 }
 0x2de   : > { %v1711_v22 = vadd.f32 1.0, %v2188_v23 }
 0x2e0   : > { %2189 = vrcp.f32 %v1711_v22 }
 0x2ea   : > { %v2190_v56 = vpop.eup %2189 }
 0x2eb   : > { %1714 = vst [vmem:[%s273_s15] sm:$0x1] %v2190_v56 }
 0x2ec   : > { %2204 = shalt.err (!%p2201_p3)
}
 0x2ed   : > { %s2205_s14 = scalar_lea.hbm %s2942_s17, 16  ;;  %s2209_s25 = scalar_lea.hbm %s2991_s7, 48 }
 0x2ee   : > { %p2206_p4 = scmp.ne.s32.totalorder %s2942_s17, %s2205_s14  ;;  %p2210_p9 = scmp.lt.u32.totalorder %s2942_s17, %s2991_s7 }
 0x2ef   : > { %p2211_p10 = scmp.lt.u32.totalorder %s2209_s25, %s2205_s14  ;;  %p2213_p12 = scmp.lt.u32.totalorder %s2205_s14, %s2942_s17 }
 0x2f0   : > { %p2207_p7 = pnand %p2206_p4, %p2335_p5 }
 0x2f1   : > { %p2212_p11 = por %p2211_p10, %p2210_p9 }
 0x2f2   : > { %p2208_p8 = pneg %p2207_p7 }
 0x2f3   : > { %p2214_p13 = por %p2213_p12, %p2212_p11 }
 0x2f5   : > { %p2215_p0 = pnand %p2214_p13, %p2208_p8 }
 0x2f7   : > { %2218 = shalt.err (!%p2215_p0)
}
 0x2f8   : > { %2073 = dma.vmem_to_hbm [thread:$0]  (%p2335_p5), %s2944_s16, 16, %s2942_s17, %s1716_s18  }
 0x2f9 PF: > { %p2079_p1 = scmp.ge.s32.totalorder %s2253_s29, 2  ;;  %s1740_s15 = sand.u32 1, %s2241_s26  }
 0x2fa   : > { %s1741_s10 = scalar_lea.sflag [#allocation4], %s1740_s15 }
 0x2fb   : > { %p2076_p2 = pnand %p2079_p1, %p2339_p6 }
 0x2fd   : > { %2236 = dma.done.wait (!%p2076_p2), %s1741_s10, 16  }
 0x2fe   : > { %2238 = vsyncadd (!%p2076_p2), %s1741_s10, 4294967280  ;;  %p19_p3 = scmp.ge.s32.totalorder %s2323_s8, 5   ;;  %s2994_s26 = smov %s2245_s27 }
 0x2ff   : > { %s2995_s27 = smov %s2249_s28  ;;  %s2996_s28 = smov %s2333_s11 }
 0x300   : > { %s2997_s29 = smov %s2323_s8  ;;  %21 = sbr.rel (!%p19_p3) target bundleno = 6 (0x6), region = 83 }
 0x307   :  { %1745 = vsyncpa [#allocation4], 1 }
 0x308   :  { %1747 = vsyncpa [#allocation4 + $0x1], 1 }

</bundles_post_ra>
